<compile_context>
chip_gen: v7x
topology: tpu7x:2x2x1
jax: 0.10.0
libtpu: 0.0.40
codegen_flags: <defaults>
</compile_context>

<pallas_src>
import jax
import jax.numpy as jnp
from jax.experimental import pallas as pl
from jax.experimental.pallas import tpu as pltpu

LANE = 128          # all layer outputs padded to full lane width
TILE_B_MAX = 1024   # batch rows per grid step (multiple of 8; sweepable)


def _round_up(n, m):
    return ((n + m - 1) // m) * m


def mnistnet_kernel(x_ref, p1_ref, p2_ref, p3_ref, o_ref):
    # x_ref : (TILE_B, 25)   streamed input rows
    # p1_ref: (26, 128)      rows 0..24 = W1 (cols 0..19 real), row 25  = b1
    # p2_ref: (129, 128)     rows 0..127 = W2 (rows 0..19 / cols 0..9 real), row 128 = b2
    # p3_ref: (129, 128)     rows 0..127 = W3 (rows 0..9  / cols 0..2 real), row 128 = b3
    # o_ref : (TILE_B, 128)  lane-dense output slab; cols 3..127 stay exactly 0
    #
    # All intermediates are full 128-lane vregs, so every op below is unmasked.
    # Garbage lanes produced by sigmoid(0) = 0.5 are annihilated by the exact
    # zero rows of the next layer's padded weight, so the real columns are
    # bit-identical to the unpadded math.
    x = x_ref[...]

    h1 = jnp.dot(x, p1_ref[:25, :], preferred_element_type=jnp.float32) + p1_ref[25:26, :]
    h1 = jax.nn.sigmoid(h1)

    h2 = jnp.dot(h1, p2_ref[:128, :], preferred_element_type=jnp.float32) + p2_ref[128:129, :]
    h2 = jax.nn.sigmoid(h2)
    # Note: on v5e, if the EUP slot ever binds at very large batch, swap the
    # sigmoid divide for pl.reciprocal(1 + jnp.exp(-x), approx=True); left exact
    # here to preserve bit-accuracy vs the reference.

    h3 = jnp.dot(h2, p3_ref[:128, :], preferred_element_type=jnp.float32) + p3_ref[128:129, :]
    o_ref[...] = h3.astype(o_ref.dtype)


def pack_params(w1, b1, w2, b2, w3, b3):
    """Pack (in, out) weights + bias row into lane-dense f32 slabs. Call once."""
    w1 = jnp.asarray(w1, jnp.float32)
    w2 = jnp.asarray(w2, jnp.float32)
    w3 = jnp.asarray(w3, jnp.float32)
    b1 = jnp.asarray(b1, jnp.float32).reshape(-1)
    b2 = jnp.asarray(b2, jnp.float32).reshape(-1)
    b3 = jnp.asarray(b3, jnp.float32).reshape(-1)

    p1 = jnp.zeros((26, LANE), jnp.float32).at[:25, :20].set(w1).at[25, :20].set(b1)
    p2 = jnp.zeros((129, LANE), jnp.float32).at[:20, :10].set(w2).at[128, :10].set(b2)
    p3 = jnp.zeros((129, LANE), jnp.float32).at[:10, :3].set(w3).at[128, :3].set(b3)
    return p1, p2, p3


@jax.jit
def mnistnet_forward(x, p1, p2, p3):
    # Flatten like x.view(-1, 5*5) on an NCHW (B, 1, 5, 5) tensor.
    x2d = x.reshape(-1, 25).astype(jnp.float32)
    B = x2d.shape[0]

    # Batch tiling: big tiles amortize the ~0.35 us per-step overhead; pad rows
    # to a tile multiple (padded rows are discarded by the final slice).
    tile_b = min(TILE_B_MAX, _round_up(B, 8))
    b_pad = _round_up(B, tile_b)
    if b_pad != B:
        x2d = jnp.pad(x2d, ((0, b_pad - B), (0, 0)))

    out = pl.pallas_call(
        mnistnet_kernel,
        out_shape=jax.ShapeDtypeStruct((b_pad, LANE), jnp.float32),
        grid_spec=pltpu.PrefetchScalarGridSpec(
            num_scalar_prefetch=0,
            grid=(pl.cdiv(b_pad, tile_b),),
            in_specs=[
                pl.BlockSpec((tile_b, 25), lambda i: (i, 0)),    # streamed per tile
                pl.BlockSpec((26, LANE), lambda i: (0, 0)),      # VMEM-resident params
                pl.BlockSpec((129, LANE), lambda i: (0, 0)),
                pl.BlockSpec((129, LANE), lambda i: (0, 0)),
            ],
            out_specs=pl.BlockSpec((tile_b, LANE), lambda i: (i, 0)),
        ),
        compiler_params=pltpu.CompilerParams(
            # Shard batch tiles across TensorCores (v7x) / megacore where available.
            dimension_semantics=("parallel",),
        ),
    )(x2d, p1, p2, p3)

    return out[:B, :3]


def init_params(key):
    # Mirrors torch.nn.Linear default init: U(-1/sqrt(fan_in), 1/sqrt(fan_in))
    # for weight and bias.  Weights stored as (in, out) so the kernel does x @ W.
    def linear_init(k, fan_in, fan_out):
        kw, kb = jax.random.split(k)
        bound = 1.0 / jnp.sqrt(fan_in)
        w = jax.random.uniform(kw, (fan_in, fan_out), jnp.float32, -bound, bound)
        b = jax.random.uniform(kb, (1, fan_out), jnp.float32, -bound, bound)
        return w, b

    k1, k2, k3 = jax.random.split(key, 3)
    w1, b1 = linear_init(k1, 25, 20)
    w2, b2 = linear_init(k2, 20, 10)
    w3, b3 = linear_init(k3, 10, 3)
    return w1, b1, w2, b2, w3, b3


def reference_forward(x, w1, b1, w2, b2, w3, b3):
    x2d = x.reshape(-1, 25)
    h1 = jax.nn.sigmoid(x2d @ w1 + b1)
    h2 = jax.nn.sigmoid(h1 @ w2 + b2)
    return h2 @ w3 + b3


if __name__ == "__main__":
    key = jax.random.PRNGKey(0)
    kx1, kx2, kp = jax.random.split(key, 3)
    raw_params = init_params(kp)
    packed = pack_params(*raw_params)   # packed once, reused across calls

    # Small batch of 5x5 "images" (NCHW with C=1), matching x.view(-1, 5*5).
    B = 8
    x_small = jax.random.normal(kx1, (B, 1, 5, 5), dtype=jnp.float32)
    out_small = jax.block_until_ready(mnistnet_forward(x_small, *packed))
    ref_small = reference_forward(x_small, *raw_params)
    assert out_small.shape == (B, 3)
    assert jnp.allclose(out_small, ref_small, atol=1e-5, rtol=1e-5), "mismatch (small batch)"

    # Larger, non-tile-multiple batch to exercise the tiled/padded grid path.
    B2 = 2050
    x_big = jax.random.normal(kx2, (B2, 1, 5, 5), dtype=jnp.float32)
    out_big = jax.block_until_ready(mnistnet_forward(x_big, *packed))
    ref_big = reference_forward(x_big, *raw_params)
    assert out_big.shape == (B2, 3)
    assert jnp.allclose(out_big, ref_big, atol=1e-5, rtol=1e-5), "mismatch (tiled batch)"

    print("KERNEL_OK")
</pallas_src>

<mosaic_0001>
module attributes {stable_mosaic.version = 11 : i64} {
  func.func @mnistnet_kernel(%arg0: i32, %arg1: memref<8x25xf32, #tpu.memory_space<vmem>>, %arg2: memref<26x128xf32, #tpu.memory_space<vmem>>, %arg3: memref<129x128xf32, #tpu.memory_space<vmem>>, %arg4: memref<129x128xf32, #tpu.memory_space<vmem>>, %arg5: memref<8x128xf32, #tpu.memory_space<vmem>>) attributes {dimension_semantics = [#tpu.dimension_semantics<parallel>], iteration_bounds = array<i64: 1>, scalar_prefetch = 0 : i64, scratch_operands = 0 : i64, tpu.core_type = #tpu.core_type<tc>, window_params = [{transform_indices = @transform_0, window_bounds = array<i64: 8, 25>}, {pipeline_mode = #tpu.pipeline_mode<synchronous>, transform_indices = @transform_1, window_bounds = array<i64: 26, 128>}, {pipeline_mode = #tpu.pipeline_mode<synchronous>, transform_indices = @transform_2, window_bounds = array<i64: 129, 128>}, {pipeline_mode = #tpu.pipeline_mode<synchronous>, transform_indices = @transform_3, window_bounds = array<i64: 129, 128>}, {transform_indices = @transform_4, window_bounds = array<i64: 8, 128>}]} {
    %c0 = arith.constant 0 : index
    %c0_0 = arith.constant 0 : index
    %0 = vector.load %arg1[%c0, %c0_0] : memref<8x25xf32, #tpu.memory_space<vmem>>, vector<8x25xf32>
    %c0_1 = arith.constant 0 : index
    %c0_2 = arith.constant 0 : index
    %1 = vector.load %arg2[%c0_1, %c0_2] : memref<26x128xf32, #tpu.memory_space<vmem>>, vector<25x128xf32>
    %cst = arith.constant dense<0.000000e+00> : vector<8x128xf32>
    %2 = tpu.matmul %0, %1, %cst {dimension_numbers = #tpu.dot_dimension_numbers<[1], [0], [0], [1], [0, 0, 1, 1], [], []>} : vector<8x25xf32>, vector<25x128xf32>, vector<8x128xf32> -> vector<8x128xf32>
    %c25 = arith.constant 25 : index
    %c0_3 = arith.constant 0 : index
    %3 = vector.load %arg2[%c25, %c0_3] : memref<26x128xf32, #tpu.memory_space<vmem>>, vector<1x128xf32>
    %4 = vector.broadcast %3 : vector<1x128xf32> to vector<8x128xf32>
    %5 = arith.addf %2, %4 : vector<8x128xf32>
    %6 = arith.negf %5 : vector<8x128xf32>
    %7 = math.exp %6 : vector<8x128xf32>
    %cst_4 = arith.constant 1.000000e+00 : f32
    %8 = vector.broadcast %cst_4 : f32 to vector<8x128xf32>
    %9 = arith.addf %8, %7 : vector<8x128xf32>
    %10 = arith.divf %8, %9 : vector<8x128xf32>
    %c0_5 = arith.constant 0 : index
    %c0_6 = arith.constant 0 : index
    %11 = vector.load %arg3[%c0_5, %c0_6] : memref<129x128xf32, #tpu.memory_space<vmem>>, vector<128x128xf32>
    %cst_7 = arith.constant dense<0.000000e+00> : vector<8x128xf32>
    %12 = tpu.matmul %10, %11, %cst_7 {dimension_numbers = #tpu.dot_dimension_numbers<[1], [0], [0], [1], [0, 0, 1, 1], [], []>} : vector<8x128xf32>, vector<128x128xf32>, vector<8x128xf32> -> vector<8x128xf32>
    %c128 = arith.constant 128 : index
    %c0_8 = arith.constant 0 : index
    %13 = vector.load %arg3[%c128, %c0_8] : memref<129x128xf32, #tpu.memory_space<vmem>>, vector<1x128xf32>
    %14 = vector.broadcast %13 : vector<1x128xf32> to vector<8x128xf32>
    %15 = arith.addf %12, %14 : vector<8x128xf32>
    %16 = arith.negf %15 : vector<8x128xf32>
    %17 = math.exp %16 : vector<8x128xf32>
    %cst_9 = arith.constant 1.000000e+00 : f32
    %18 = vector.broadcast %cst_9 : f32 to vector<8x128xf32>
    %19 = arith.addf %18, %17 : vector<8x128xf32>
    %20 = arith.divf %18, %19 : vector<8x128xf32>
    %c0_10 = arith.constant 0 : index
    %c0_11 = arith.constant 0 : index
    %21 = vector.load %arg4[%c0_10, %c0_11] : memref<129x128xf32, #tpu.memory_space<vmem>>, vector<128x128xf32>
    %cst_12 = arith.constant dense<0.000000e+00> : vector<8x128xf32>
    %22 = tpu.matmul %20, %21, %cst_12 {dimension_numbers = #tpu.dot_dimension_numbers<[1], [0], [0], [1], [0, 0, 1, 1], [], []>} : vector<8x128xf32>, vector<128x128xf32>, vector<8x128xf32> -> vector<8x128xf32>
    %c128_13 = arith.constant 128 : index
    %c0_14 = arith.constant 0 : index
    %23 = vector.load %arg4[%c128_13, %c0_14] : memref<129x128xf32, #tpu.memory_space<vmem>>, vector<1x128xf32>
    %24 = vector.broadcast %23 : vector<1x128xf32> to vector<8x128xf32>
    %25 = arith.addf %22, %24 : vector<8x128xf32>
    %c0_15 = arith.constant 0 : index
    %c0_16 = arith.constant 0 : index
    %26 = vector.load %arg5[%c0_15, %c0_16] : memref<8x128xf32, #tpu.memory_space<vmem>>, vector<8x128xf32>
    tpu.vector_store %arg5[%c0_15, %c0_16], %25 {strides = array<i32>} : memref<8x128xf32, #tpu.memory_space<vmem>>, vector<8x128xf32>,
    return
  }
  func.func @transform_0(%arg0: i32) -> (i32, i32) {
    %c0_i32 = arith.constant 0 : i32
    %c0_i32_0 = arith.constant 0 : i32
    return %arg0, %c0_i32 : i32, i32
  }
  func.func @transform_1(%arg0: i32) -> (i32, i32) {
    %c0_i32 = arith.constant 0 : i32
    %c0_i32_0 = arith.constant 0 : i32
    %c0_i32_1 = arith.constant 0 : i32
    return %c0_i32, %c0_i32_0 : i32, i32
  }
  func.func @transform_2(%arg0: i32) -> (i32, i32) {
    %c0_i32 = arith.constant 0 : i32
    %c0_i32_0 = arith.constant 0 : i32
    %c0_i32_1 = arith.constant 0 : i32
    return %c0_i32, %c0_i32_0 : i32, i32
  }
  func.func @transform_3(%arg0: i32) -> (i32, i32) {
    %c0_i32 = arith.constant 0 : i32
    %c0_i32_0 = arith.constant 0 : i32
    %c0_i32_1 = arith.constant 0 : i32
    return %c0_i32, %c0_i32_0 : i32, i32
  }
  func.func @transform_4(%arg0: i32) -> (i32, i32) {
    %c0_i32 = arith.constant 0 : i32
    %c0_i32_0 = arith.constant 0 : i32
    return %arg0, %c0_i32 : i32, i32
  }
}

</mosaic_0001>

<bundles_post_ra>
// kernel: mnistnet_forward.1
= control target key start
LH: loop header
LB: loop body
LE: loop exit
PB: predicated region body
PF: predicated region fallthrough
CT: control target
= control target key end

     0   :  { %9 = vsyncpa [#allocation3], 0  ;;  %s540_s15 = smov [#allocation2]   ;;  %s677_s0 = inlined_call_operand.vmem [shape: f32[8,25], index: 0, kind: input, shape index: {}]   ;;  %s678_s1 = inlined_call_operand.vmem [shape: f32[26,128], index: 1, kind: input, shape index: {}]   ;;  %s679_s2 = inlined_call_operand.vmem [shape: f32[129,128], index: 2, kind: input, shape index: {}]   ;;  %s680_s3 = inlined_call_operand.hbm [shape: f32[129,128], index: 3, kind: input, shape index: {}]   ;;  %s681_s4 = inlined_call_operand.vmem [shape: f32[8,128], index: 4, kind: output, shape index: {}]  }
   0x1   :  { %s21_s16 = sshll.u32 %s540_s15, 4  ;;  %s516_s19 = scalar_lea.hbm %s680_s3, 2176  ;;  %s22_s16 = int_to_ptr.vmem [resolvable:$true] %s21_s16 }
   0x2   :  { %p517_p0 = scmp.ne.s32.totalorder %s680_s3, %s516_s19  ;;  %p520_p1 = scmp.lt.u32.totalorder %s516_s19, %s680_s3 }
   0x4   :  { %p522_p2 = pnand %p520_p1, %p517_p0 }
   0x6   :  { %525 = shalt.err (!%p522_p2)
}
   0x7   :  { %s526_s24 = scalar_lea.vmem %s22_s16, 2176  ;;  %p531_p4 = scmp.lt.s32.totalorder %s22_s16, %s22_s16 }
   0x8   :  { %p527_p3 = scmp.ne.s32.totalorder %s22_s16, %s526_s24  ;;  %p532_p5 = scmp.lt.s32.totalorder %s526_s24, %s526_s24 }
   0xa   :  { %p533_p6 = por %p532_p5, %p531_p4 }
   0xc   :  { %p534_p7 = pnand %p533_p6, %p527_p3 }
   0xe   :  { %537 = shalt.err (!%p534_p7)
}
   0xf   :  { %s541_s25 = smov 128   ;;  %s542_s26 = smov 8  }
  0x10   :  { %27 = dma.hbm_to_vmem [thread:$0]  %s680_s3, 2176, %s22_s16, [#allocation3], %s541_s25, %s541_s25, %s542_s26  }
  0x11   :  { %538 = dma.done.wait [#allocation3], 2176  }
  0x12   :  { %539 = vsyncadd [#allocation3], 4294965120  ;;  %v543_v0 = vmov 0.0|0.0   ;;  %vm544_vm0 = vmmov 0   ;;  %v545_v1 = vmov 0.0   ;;  %v32_v2 = vld [vmem:[%s678_s1] sm:$0xff] }
  0x13   :  { %446 = vmatprep.subr.bf16.mxu0 %v543_v0  ;;  %453 = vmatprep.subr.bf16.mxu1 %v543_v0  ;;  %v33_v3 = vld [vmem:[%s678_s1 + $0x8] sm:$0xff]  ;;  %v34_v4 = vld [vmem:[%s678_s1 + $0x10] sm:$0xff]  ;;  %v35_v6 = vld [vmem:[%s678_s1 + $0x18] sm:$0x1]  ;;  %vm45_vm1 = vcmask 1040384   ;;  %vm546_vm2 = vmmov 1  }
  0x14   :  { %373 = vmatprep.mubr.msk.f32.mxu0 %vm544_vm0, %v545_v1  ;;  %408 = vmatprep.mubr.msk.f32.mxu1 %vm544_vm0, %v545_v1  ;;  %v447_v5 = vpack.c.bf16 %v33_v3, %v32_v2  ;;  %v125_v7 = vld [vmem:[%s679_s2] sm:$0xff]  ;;  %v126_v8 = vld [vmem:[%s679_s2 + $0x8] sm:$0xff]  ;;  %v450_v9 = vpack.c.bf16 %v35_v6, %v34_v4  ;;  %vm451_vm3 = vmpackc.low %vm45_vm1, %vm546_vm2  ;;  %vm41_vm4 = vcmask 203776  }
  0x15   :  { %v454_v10 = vpack.c.bf16 %v126_v8, %v125_v7  ;;  %v31_v11 = vld [vmem:[%s677_s0] sm:$0xff]  ;;  %v127_v12 = vld [vmem:[%s679_s2 + $0x10] sm:$0xff]  ;;  %v128_v13 = vld [vmem:[%s679_s2 + $0x18] sm:$0xff] }
  0x16   :  { %448 = vmatpush3.bf16.msra.mxu0 %v447_v5  ;;  %v457_v14 = vpack.c.bf16 %v128_v13, %v127_v12  ;;  %v129_v15 = vld [vmem:[%s679_s2 + $0x20] sm:$0xff]  ;;  %v130_v16 = vld [vmem:[%s679_s2 + $0x28] sm:$0xff]  ;;  %v131_v18 = vld [vmem:[%s679_s2 + $0x30] sm:$0xff] }
  0x17   :  { %449 = vmatprep.subr.bf16.mxu0 %v543_v0  ;;  %455 = vmatpush3.bf16.msra.mxu1 %v454_v10  ;;  %v460_v17 = vpack.c.bf16 %v130_v16, %v129_v15  ;;  %v132_v19 = vld [vmem:[%s679_s2 + $0x38] sm:$0xff]  ;;  %v133_v21 = vld [vmem:[%s679_s2 + $0x40] sm:$0xff]  ;;  %v134_v22 = vld [vmem:[%s679_s2 + $0x48] sm:$0xff] }
  0x18   :  { %456 = vmatprep.subr.bf16.mxu1 %v543_v0  ;;  %v463_v20 = vpack.c.bf16 %v132_v19, %v131_v18  ;;  %v466_v23 = vpack.c.bf16 %v134_v22, %v133_v21  ;;  %v135_v24 = vld [vmem:[%s679_s2 + $0x50] sm:$0xff]  ;;  %v136_v25 = vld [vmem:[%s679_s2 + $0x58] sm:$0xff]  ;;  %v137_v27 = vld [vmem:[%s679_s2 + $0x60] sm:$0xff] }
  0x19   :  { %v469_v26 = vpack.c.bf16 %v136_v25, %v135_v24  ;;  %v138_v28 = vld [vmem:[%s679_s2 + $0x68] sm:$0xff]  ;;  %v139_v30 = vld [vmem:[%s679_s2 + $0x70] sm:$0xff]  ;;  %v140_v31 = vld [vmem:[%s679_s2 + $0x78] sm:$0xff] }
  0x1a   :  { %452 = vmatpush3.bf16.msk.msra.mxu0 %vm451_vm3, %v450_v9  ;;  %v472_v29 = vpack.c.bf16 %v138_v28, %v137_v27  ;;  %v475_v32 = vpack.c.bf16 %v140_v31, %v139_v30  ;;  %v222_v33 = vld [vmem:[#allocation2] sm:$0xff]  ;;  %v223_v34 = vld [vmem:[#allocation2 + $0x8] sm:$0xff]  ;;  %v319_v36 = vld [vmem:[%s678_s1 + $0x19] ss:$0 sm:$0xff] }
  0x1b   :  { %477 = vmatprep.subr.bf16.mxu0 %v543_v0  ;;  %458 = vmatpush3.bf16.msra.mxu1 %v457_v14  ;;  %v478_v35 = vpack.c.bf16 %v223_v34, %v222_v33  ;;  %v224_v44 = vld [vmem:[#allocation2 + $0x10] sm:$0xff]  ;;  %v225_v45 = vld [vmem:[#allocation2 + $0x18] sm:$0xff]  ;;  %v226_v47 = vld [vmem:[#allocation2 + $0x20] sm:$0xff] }
  0x1c   :  { %459 = vmatprep.subr.bf16.mxu1 %v543_v0  ;;  %v481_v46 = vpack.c.bf16 %v225_v45, %v224_v44  ;;  %v227_v48 = vld [vmem:[#allocation2 + $0x28] sm:$0xff]  ;;  %v228_v50 = vld [vmem:[#allocation2 + $0x30] sm:$0xff]  ;;  %v229_v51 = vld [vmem:[#allocation2 + $0x38] sm:$0xff] }
  0x1d   :  { %374 = vmatmul.mubr.msk.f32.vlgmr.msra.gmra.mrb[0].mxu0 %vm41_vm4, %v31_v11  ;;  %v484_v49 = vpack.c.bf16 %v227_v48, %v226_v47  ;;  %v487_v52 = vpack.c.bf16 %v229_v51, %v228_v50  ;;  %v230_v53 = vld [vmem:[#allocation2 + $0x40] sm:$0xff]  ;;  %v231_v54 = vld [vmem:[#allocation2 + $0x48] sm:$0xff]  ;;  %v232_v56 = vld [vmem:[#allocation2 + $0x50] sm:$0xff] }
  0x1e   :  { %443 = vmatprep.mubr.msk.f32.mxu0 %vm544_vm0, %v545_v1  ;;  %479 = vmatpush3.bf16.msra.mxu0 %v478_v35  ;;  %v490_v55 = vpack.c.bf16 %v231_v54, %v230_v53  ;;  %v233_v57 = vld [vmem:[#allocation2 + $0x58] sm:$0xff]  ;;  %v234_v59 = vld [vmem:[#allocation2 + $0x60] sm:$0xff]  ;;  %v235_v60 = vld [vmem:[#allocation2 + $0x68] sm:$0xff] }
  0x1f   :  { %461 = vmatpush3.bf16.msra.mxu1 %v460_v17  ;;  %480 = vmatprep.subr.bf16.mxu0 %v543_v0  ;;  %v493_v58 = vpack.c.bf16 %v233_v57, %v232_v56  ;;  %v496_v61 = vpack.c.bf16 %v235_v60, %v234_v59  ;;  %v236_v62 = vld [vmem:[#allocation2 + $0x70] sm:$0xff]  ;;  %v237_v63 = vld [vmem:[#allocation2 + $0x78] sm:$0xff]  ;;  %v323_v2 = vld [vmem:[%s679_s2 + $0x80] ss:$0 sm:$0xff] }
  0x20   :  { %462 = vmatprep.subr.bf16.mxu1 %v543_v0  ;;  %v499_v1 = vpack.c.bf16 %v237_v63, %v236_v62  ;;  %v325_v10 = vld [vmem:[#allocation2 + $0x80] ss:$0 sm:$0xff] }
  0x22   :  { %482 = vmatpush3.bf16.msra.mxu0 %v481_v46 }
  0x23   :  { %464 = vmatpush3.bf16.msra.mxu1 %v463_v20  ;;  %483 = vmatprep.subr.bf16.mxu0 %v543_v0 }
  0x24   :  { %465 = vmatprep.subr.bf16.mxu1 %v543_v0 }
  0x26   :  { %485 = vmatpush3.bf16.msra.mxu0 %v484_v49 }
  0x27   :  { %467 = vmatpush3.bf16.msra.mxu1 %v466_v23  ;;  %486 = vmatprep.subr.bf16.mxu0 %v543_v0 }
  0x28   :  { %468 = vmatprep.subr.bf16.mxu1 %v543_v0 }
  0x2a   :  { %488 = vmatpush3.bf16.msra.mxu0 %v487_v52 }
  0x2b   :  { %470 = vmatpush3.bf16.msra.mxu1 %v469_v26  ;;  %489 = vmatprep.subr.bf16.mxu0 %v543_v0 }
  0x2c   :  { %471 = vmatprep.subr.bf16.mxu1 %v543_v0 }
  0x2e   :  { %491 = vmatpush3.bf16.msra.mxu0 %v490_v55 }
  0x2f   :  { %473 = vmatpush3.bf16.msra.mxu1 %v472_v29  ;;  %492 = vmatprep.subr.bf16.mxu0 %v543_v0 }
  0x30   :  { %474 = vmatprep.subr.bf16.mxu1 %v543_v0 }
  0x32   :  { %494 = vmatpush3.bf16.msra.mxu0 %v493_v58 }
  0x33   :  { %476 = vmatpush3.bf16.msra.mxu1 %v475_v32  ;;  %495 = vmatprep.subr.bf16.mxu0 %v543_v0 }
  0x36   :  { %497 = vmatpush3.bf16.msra.mxu0 %v496_v61 }
  0x37   :  { %498 = vmatprep.subr.bf16.mxu0 %v543_v0 }
  0x3a   :  { %500 = vmatpush3.bf16.msra.mxu0 %v499_v1 }
  0xf0   :  { %v115_v37 = vpop.f32.mrb[0].mxu0 }
  0xf1   :  { %v116_v38 = vadd.f32 %v319_v36, %v115_v37  ;;  %v375_v39 = vpop.f32.mrb[1].mxu0 }
  0xf3   :  { %v322_v40 = vmul.f32 -1.442695, %v116_v38 }
  0xf5   :  { %508 = vpow2.f32 %v322_v40 }
  0xff   :  { %v509_v41 = vpop.eup %508 }
 0x100   :  { %v122_v42 = vadd.f32 1.0, %v509_v41 }
 0x102   :  { %510 = vrcp.f32 %v122_v42 }
 0x10c   :  { %v511_v43 = vpop.eup %510 }
 0x10d   :  { %409 = vmatmul.mubr.f32.vlgmr.msra.gmra.mrb[0].mxu1 %v511_v43 }
 0x1e0   :  { %v212_v3 = vpop.f32.mrb[0].mxu1 }
 0x1e1   :  { %v213_v4 = vadd.f32 %v323_v2, %v212_v3  ;;  %v410_v5 = vpop.f32.mrb[1].mxu1 }
 0x1e3   :  { %v324_v6 = vmul.f32 -1.442695, %v213_v4 }
 0x1e5   :  { %512 = vpow2.f32 %v324_v6 }
 0x1ef   :  { %v513_v7 = vpop.eup %512 }
 0x1f0   :  { %v219_v8 = vadd.f32 1.0, %v513_v7 }
 0x1f2   :  { %514 = vrcp.f32 %v219_v8 }
 0x1fc   :  { %v515_v9 = vpop.eup %514 }
 0x1fd   :  { %444 = vmatmul.mubr.f32.vlgmr.msra.gmra.mrb[2].mxu0 %v515_v9 }
 0x2d0   :  { %v309_v11 = vpop.f32.mrb[2].mxu0 }
 0x2d1   :  { %v310_v12 = vadd.f32 %v325_v10, %v309_v11  ;;  %v445_v13 = vpop.f32.mrb[3].mxu0 }
 0x2d3   :  { %313 = vst [vmem:[%s681_s4] sm:$0xff] %v310_v12 }
 0x2d4   :  { %318 = vsyncpa [#allocation3], 1 }

</bundles_post_ra>
